<compile_context>
chip_gen: v5e
topology: v5e:2x2
jax: 0.10.0
libtpu: 0.0.40
codegen_flags: <defaults>
</compile_context>

<pallas_src>
import functools
import math

import jax
import jax.numpy as jnp
from jax.experimental import pallas as pl
from jax.experimental.pallas import tpu as pltpu


def _make_rnn_fc_kernel(T, Bp, L):
    """Build the single-shot kernel for static (T, padded-batch, num_layers)."""

    def kernel(*refs):
        if L > 1:
            (x_ref, s_ref, wih0_ref, wihr_ref, whh_ref, b_ref,
             wfch_ref, wfcs_ref, bfc_ref, out_ref) = refs
        else:
            (x_ref, s_ref, wih0_ref, whh_ref, b_ref,
             wfch_ref, wfcs_ref, bfc_ref, out_ref) = refs
            wihr_ref = None

        bf16 = jnp.bfloat16

        # Layer 0: input->hidden projection for ALL timesteps in one MXU call,
        # bias folded in (b_ref already holds b_ih + b_hh).  f32 accumulate.
        pre0 = (jnp.dot(x_ref[...], wih0_ref[...],
                        preferred_element_type=jnp.float32) + b_ref[0])

        # Load each small weight exactly once (bf16).
        whh = [whh_ref[l] for l in range(L)]                    # (H, H)
        wihr = [wihr_ref[l] for l in range(L - 1)] if L > 1 else []
        bias_r = [b_ref[l] for l in range(1, L)]                # (1, H) f32

        h = [None] * L
        # Wavefront: round r executes layer l's timestep t = r - l.  Every
        # layer-step inside a round only reads values committed in round r-1,
        # so the L matmul chains overlap; dependent chain = T + L - 1 rounds.
        for r in range(T + L - 1):                              # static unroll
            nh = list(h)
            for l in range(L):
                t = r - l
                if t < 0 or t >= T:
                    continue
                if l == 0:
                    if t == 0:
                        # h_{-1} == 0 -> hh matmul skipped.
                        nh[0] = jnp.maximum(pre0[0:Bp, :], 0.0)
                    else:
                        nh[0] = jnp.maximum(
                            pre0[t * Bp:(t + 1) * Bp, :]
                            + jnp.dot(h[0].astype(bf16), whh[0],
                                      preferred_element_type=jnp.float32),
                            0.0)
                else:
                    # ih projection from the previous layer's step-t output
                    # (committed last round); independent of this layer's hh.
                    acc = (jnp.dot(h[l - 1].astype(bf16), wihr[l - 1],
                                   preferred_element_type=jnp.float32)
                           + bias_r[l - 1])
                    if t > 0:                                   # t==0: h_{-1}==0
                        acc = acc + jnp.dot(h[l].astype(bf16), whh[l],
                                            preferred_element_type=jnp.float32)
                    nh[l] = jnp.maximum(acc, 0.0)
            h = nh

        # fc over concat([h_last, s]) as a split matmul (fc weight pre-split).
        out = (jnp.dot(h[L - 1].astype(bf16), wfch_ref[...],
                       preferred_element_type=jnp.float32)
               + jnp.dot(s_ref[...], wfcs_ref[...],
                         preferred_element_type=jnp.float32)
               + bfc_ref[...])
        out_ref[...] = out.astype(out_ref.dtype)

    return kernel


def init_params(key, in_features, hidden_size, num_layers, s_features):
    """Deterministic init mirroring PyTorch nn.RNN / nn.Linear shapes."""
    k = 1.0 / math.sqrt(hidden_size)
    keys = jax.random.split(key, 4 * num_layers + 2)
    ki = iter(keys)

    def u(rng, shape):
        return jax.random.uniform(rng, shape, jnp.float32, -k, k)

    w_ih = [u(next(ki), (hidden_size, in_features if l == 0 else hidden_size))
            for l in range(num_layers)]
    w_hh = [u(next(ki), (hidden_size, hidden_size)) for _ in range(num_layers)]
    b_ih = [u(next(ki), (hidden_size,)) for _ in range(num_layers)]
    b_hh = [u(next(ki), (hidden_size,)) for _ in range(num_layers)]
    fc_in = hidden_size + s_features
    kf = 1.0 / math.sqrt(fc_in)
    w_fc = jax.random.uniform(next(ki), (1, fc_in), jnp.float32, -kf, kf)
    b_fc = jax.random.uniform(next(ki), (1,), jnp.float32, -kf, kf)
    return dict(w_ih=w_ih, w_hh=w_hh, b_ih=b_ih, b_hh=b_hh, w_fc=w_fc, b_fc=b_fc)


def preprocess_params(params, *, compute_dtype=jnp.bfloat16):
    """One-time weight prep (transpose / stack / bias-sum / bf16 cast)."""
    L = len(params["w_hh"])
    H = params["w_hh"][0].shape[0]
    cd = compute_dtype
    prepped = {
        "wih0": params["w_ih"][0].T.astype(cd),                              # (F, H)
        "whh": jnp.stack([w.T for w in params["w_hh"]], 0).astype(cd),       # (L, H, H)
        "bias": (jnp.stack(params["b_ih"], 0)
                 + jnp.stack(params["b_hh"], 0)).reshape(L, 1, H)
                .astype(jnp.float32),
        "wfc_h": params["w_fc"][:, :H].T.astype(cd),                         # (H, 1)
        "wfc_s": params["w_fc"][:, H:].T.astype(cd),                         # (S, 1)
        "bfc": params["b_fc"].reshape(1, 1).astype(jnp.float32),             # (1, 1)
    }
    if L > 1:
        prepped["wihr"] = jnp.stack([w.T for w in params["w_ih"][1:]],
                                    0).astype(cd)                            # (L-1, H, H)
    return prepped


@functools.partial(jax.jit, static_argnames=("num_layers",))
def rnn_forward(x, s, prepped, *, num_layers):
    B, T, F = x.shape
    L = num_layers
    Bp = max(8, ((B + 7) // 8) * 8)                          # full sublane group
    cd = prepped["whh"].dtype

    # Layout plumbing only: pad batch, time-major, flatten, cast to bf16.
    # TODO(synk): at large T*B fold this transpose into the kernel DMA via a
    #             grid/index_map instead of a time-major HBM copy per call.
    xf = x.astype(jnp.float32)
    sf = s.astype(jnp.float32)
    if Bp != B:
        xf = jnp.pad(xf, ((0, Bp - B), (0, 0), (0, 0)))
        sf = jnp.pad(sf, ((0, Bp - B), (0, 0)))
    x_tm = jnp.transpose(xf, (1, 0, 2)).reshape(T * Bp, F).astype(cd)
    s_in = sf.astype(cd)

    vmem = pl.BlockSpec(memory_space=pltpu.MemorySpace.VMEM)
    kernel = _make_rnn_fc_kernel(T, Bp, L)

    inputs = [x_tm, s_in, prepped["wih0"]]
    if L > 1:
        inputs.append(prepped["wihr"])
    inputs += [prepped["whh"], prepped["bias"], prepped["wfc_h"],
               prepped["wfc_s"], prepped["bfc"]]

    out = pl.pallas_call(
        kernel,
        out_shape=jax.ShapeDtypeStruct((Bp, 1), jnp.float32),
        in_specs=[vmem] * len(inputs),
        out_specs=vmem,
    )(*inputs)
    return out[:B]


def rnn_forward_ref(x, s, params, *, num_layers):
    """Pure-JAX f32 reference (mirrors torch nn.RNN eval forward)."""
    B, T, F = x.shape
    H = params["w_hh"][0].shape[0]
    inp = x.astype(jnp.float32)
    for l in range(num_layers):
        w_ih, w_hh = params["w_ih"][l], params["w_hh"][l]
        b = params["b_ih"][l] + params["b_hh"][l]
        h = jnp.zeros((B, H), jnp.float32)
        outs = []
        for t in range(T):
            h = jnp.maximum(inp[:, t, :] @ w_ih.T + h @ w_hh.T + b, 0.0)
            outs.append(h)
        inp = jnp.stack(outs, axis=1)
    cat = jnp.concatenate([inp[:, -1, :], s.astype(jnp.float32)], axis=1)
    return cat @ params["w_fc"].T + params["b_fc"]


if __name__ == "__main__":
    # Small shapes implied by the module's forward:
    #   x: (batch, seq, in_features), s: (batch, s_features)
    batch, seq, in_features = 4, 8, 8
    hidden_size, num_layers = 32, 2
    s_features = 4

    key = jax.random.PRNGKey(0)
    kx, ks, kp = jax.random.split(key, 3)
    x = jax.random.normal(kx, (batch, seq, in_features), jnp.float32)
    s = jax.random.normal(ks, (batch, s_features), jnp.float32)
    params = init_params(kp, in_features, hidden_size, num_layers, s_features)
    prepped = preprocess_params(params)          # one-time weight prep, not per call

    out = rnn_forward(x, s, prepped, num_layers=num_layers)
    out = jax.block_until_ready(out)

    ref = rnn_forward_ref(x, s, params, num_layers=num_layers)
    assert out.shape == (batch, 1)
    # bf16 MXU operands -> relaxed tolerance vs. the f32 reference.
    assert jnp.allclose(out, ref, atol=5e-2, rtol=5e-2), (out, ref)
    print("KERNEL_OK")
</pallas_src>

<mosaic_0001>
module attributes {stable_mosaic.version = 11 : i64} {
  func.func @kernel(%arg0: memref<64x8xbf16, #tpu.memory_space<vmem>>, %arg1: memref<8x4xbf16, #tpu.memory_space<vmem>>, %arg2: memref<8x32xbf16, #tpu.memory_space<vmem>>, %arg3: memref<1x32x32xbf16, #tpu.memory_space<vmem>>, %arg4: memref<2x32x32xbf16, #tpu.memory_space<vmem>>, %arg5: memref<2x1x32xf32, #tpu.memory_space<vmem>>, %arg6: memref<32x1xbf16, #tpu.memory_space<vmem>>, %arg7: memref<4x1xbf16, #tpu.memory_space<vmem>>, %arg8: memref<1x1xf32, #tpu.memory_space<vmem>>, %arg9: memref<8x1xf32, #tpu.memory_space<vmem>>) attributes {dimension_semantics = [], scalar_prefetch = 0 : i64, scratch_operands = 0 : i64, tpu.core_type = #tpu.core_type<tc>} {
    %c0 = arith.constant 0 : index
    %c0_0 = arith.constant 0 : index
    %0 = vector.load %arg0[%c0, %c0_0] : memref<64x8xbf16, #tpu.memory_space<vmem>>, vector<64x8xbf16>
    %c0_1 = arith.constant 0 : index
    %c0_2 = arith.constant 0 : index
    %1 = vector.load %arg2[%c0_1, %c0_2] : memref<8x32xbf16, #tpu.memory_space<vmem>>, vector<8x32xbf16>
    %cst = arith.constant dense<0.000000e+00> : vector<64x32xf32>
    %2 = tpu.matmul %0, %1, %cst {dimension_numbers = #tpu.dot_dimension_numbers<[1], [0], [0], [1], [0, 0, 1, 1], [], []>} : vector<64x8xbf16>, vector<8x32xbf16>, vector<64x32xf32> -> vector<64x32xf32>
    %c0_3 = arith.constant 0 : index
    %c0_4 = arith.constant 0 : index
    %c0_5 = arith.constant 0 : index
    %3 = vector.load %arg5[%c0_3, %c0_4, %c0_5] : memref<2x1x32xf32, #tpu.memory_space<vmem>>, vector<1x1x32xf32>
    %4 = vector.shape_cast %3 : vector<1x1x32xf32> to vector<1x32xf32>
    %5 = vector.broadcast %4 : vector<1x32xf32> to vector<64x32xf32>
    %6 = arith.addf %2, %5 : vector<64x32xf32>
    %c0_6 = arith.constant 0 : index
    %c0_7 = arith.constant 0 : index
    %c0_8 = arith.constant 0 : index
    %7 = vector.load %arg4[%c0_6, %c0_7, %c0_8] : memref<2x32x32xbf16, #tpu.memory_space<vmem>>, vector<1x32x32xbf16>
    %8 = vector.shape_cast %7 : vector<1x32x32xbf16> to vector<32x32xbf16>
    %c1 = arith.constant 1 : index
    %c0_9 = arith.constant 0 : index
    %c0_10 = arith.constant 0 : index
    %9 = vector.load %arg4[%c1, %c0_9, %c0_10] : memref<2x32x32xbf16, #tpu.memory_space<vmem>>, vector<1x32x32xbf16>
    %10 = vector.shape_cast %9 : vector<1x32x32xbf16> to vector<32x32xbf16>
    %c0_11 = arith.constant 0 : index
    %c0_12 = arith.constant 0 : index
    %c0_13 = arith.constant 0 : index
    %11 = vector.load %arg3[%c0_11, %c0_12, %c0_13] : memref<1x32x32xbf16, #tpu.memory_space<vmem>>, vector<1x32x32xbf16>
    %12 = vector.shape_cast %11 : vector<1x32x32xbf16> to vector<32x32xbf16>
    %c1_14 = arith.constant 1 : index
    %c0_15 = arith.constant 0 : index
    %c0_16 = arith.constant 0 : index
    %13 = vector.load %arg5[%c1_14, %c0_15, %c0_16] : memref<2x1x32xf32, #tpu.memory_space<vmem>>, vector<1x1x32xf32>
    %14 = vector.shape_cast %13 : vector<1x1x32xf32> to vector<1x32xf32>
    %15 = vector.extract_strided_slice %6 {offsets = [0, 0], sizes = [8, 32], strides = [1, 1]} : vector<64x32xf32> to vector<8x32xf32>
    %cst_17 = arith.constant 0.000000e+00 : f32
    %16 = vector.broadcast %cst_17 : f32 to vector<8x32xf32>
    %17 = arith.maximumf %15, %16 : vector<8x32xf32>
    %18 = vector.extract_strided_slice %6 {offsets = [8, 0], sizes = [8, 32], strides = [1, 1]} : vector<64x32xf32> to vector<8x32xf32>
    %19 = arith.truncf %17 : vector<8x32xf32> to vector<8x32xbf16>
    %cst_18 = arith.constant dense<0.000000e+00> : vector<8x32xf32>
    %20 = tpu.matmul %19, %8, %cst_18 {dimension_numbers = #tpu.dot_dimension_numbers<[1], [0], [0], [1], [0, 0, 1, 1], [], []>} : vector<8x32xbf16>, vector<32x32xbf16>, vector<8x32xf32> -> vector<8x32xf32>
    %21 = arith.addf %18, %20 : vector<8x32xf32>
    %cst_19 = arith.constant 0.000000e+00 : f32
    %22 = vector.broadcast %cst_19 : f32 to vector<8x32xf32>
    %23 = arith.maximumf %21, %22 : vector<8x32xf32>
    %24 = arith.truncf %17 : vector<8x32xf32> to vector<8x32xbf16>
    %cst_20 = arith.constant dense<0.000000e+00> : vector<8x32xf32>
    %25 = tpu.matmul %24, %12, %cst_20 {dimension_numbers = #tpu.dot_dimension_numbers<[1], [0], [0], [1], [0, 0, 1, 1], [], []>} : vector<8x32xbf16>, vector<32x32xbf16>, vector<8x32xf32> -> vector<8x32xf32>
    %26 = vector.broadcast %14 : vector<1x32xf32> to vector<8x32xf32>
    %27 = arith.addf %25, %26 : vector<8x32xf32>
    %cst_21 = arith.constant 0.000000e+00 : f32
    %28 = vector.broadcast %cst_21 : f32 to vector<8x32xf32>
    %29 = arith.maximumf %27, %28 : vector<8x32xf32>
    %30 = vector.extract_strided_slice %6 {offsets = [16, 0], sizes = [8, 32], strides = [1, 1]} : vector<64x32xf32> to vector<8x32xf32>
    %31 = arith.truncf %23 : vector<8x32xf32> to vector<8x32xbf16>
    %cst_22 = arith.constant dense<0.000000e+00> : vector<8x32xf32>
    %32 = tpu.matmul %31, %8, %cst_22 {dimension_numbers = #tpu.dot_dimension_numbers<[1], [0], [0], [1], [0, 0, 1, 1], [], []>} : vector<8x32xbf16>, vector<32x32xbf16>, vector<8x32xf32> -> vector<8x32xf32>
    %33 = arith.addf %30, %32 : vector<8x32xf32>
    %cst_23 = arith.constant 0.000000e+00 : f32
    %34 = vector.broadcast %cst_23 : f32 to vector<8x32xf32>
    %35 = arith.maximumf %33, %34 : vector<8x32xf32>
    %36 = arith.truncf %23 : vector<8x32xf32> to vector<8x32xbf16>
    %cst_24 = arith.constant dense<0.000000e+00> : vector<8x32xf32>
    %37 = tpu.matmul %36, %12, %cst_24 {dimension_numbers = #tpu.dot_dimension_numbers<[1], [0], [0], [1], [0, 0, 1, 1], [], []>} : vector<8x32xbf16>, vector<32x32xbf16>, vector<8x32xf32> -> vector<8x32xf32>
    %38 = vector.broadcast %14 : vector<1x32xf32> to vector<8x32xf32>
    %39 = arith.addf %37, %38 : vector<8x32xf32>
    %40 = arith.truncf %29 : vector<8x32xf32> to vector<8x32xbf16>
    %cst_25 = arith.constant dense<0.000000e+00> : vector<8x32xf32>
    %41 = tpu.matmul %40, %10, %cst_25 {dimension_numbers = #tpu.dot_dimension_numbers<[1], [0], [0], [1], [0, 0, 1, 1], [], []>} : vector<8x32xbf16>, vector<32x32xbf16>, vector<8x32xf32> -> vector<8x32xf32>
    %42 = arith.addf %39, %41 : vector<8x32xf32>
    %cst_26 = arith.constant 0.000000e+00 : f32
    %43 = vector.broadcast %cst_26 : f32 to vector<8x32xf32>
    %44 = arith.maximumf %42, %43 : vector<8x32xf32>
    %45 = vector.extract_strided_slice %6 {offsets = [24, 0], sizes = [8, 32], strides = [1, 1]} : vector<64x32xf32> to vector<8x32xf32>
    %46 = arith.truncf %35 : vector<8x32xf32> to vector<8x32xbf16>
    %cst_27 = arith.constant dense<0.000000e+00> : vector<8x32xf32>
    %47 = tpu.matmul %46, %8, %cst_27 {dimension_numbers = #tpu.dot_dimension_numbers<[1], [0], [0], [1], [0, 0, 1, 1], [], []>} : vector<8x32xbf16>, vector<32x32xbf16>, vector<8x32xf32> -> vector<8x32xf32>
    %48 = arith.addf %45, %47 : vector<8x32xf32>
    %cst_28 = arith.constant 0.000000e+00 : f32
    %49 = vector.broadcast %cst_28 : f32 to vector<8x32xf32>
    %50 = arith.maximumf %48, %49 : vector<8x32xf32>
    %51 = arith.truncf %35 : vector<8x32xf32> to vector<8x32xbf16>
    %cst_29 = arith.constant dense<0.000000e+00> : vector<8x32xf32>
    %52 = tpu.matmul %51, %12, %cst_29 {dimension_numbers = #tpu.dot_dimension_numbers<[1], [0], [0], [1], [0, 0, 1, 1], [], []>} : vector<8x32xbf16>, vector<32x32xbf16>, vector<8x32xf32> -> vector<8x32xf32>
    %53 = vector.broadcast %14 : vector<1x32xf32> to vector<8x32xf32>
    %54 = arith.addf %52, %53 : vector<8x32xf32>
    %55 = arith.truncf %44 : vector<8x32xf32> to vector<8x32xbf16>
    %cst_30 = arith.constant dense<0.000000e+00> : vector<8x32xf32>
    %56 = tpu.matmul %55, %10, %cst_30 {dimension_numbers = #tpu.dot_dimension_numbers<[1], [0], [0], [1], [0, 0, 1, 1], [], []>} : vector<8x32xbf16>, vector<32x32xbf16>, vector<8x32xf32> -> vector<8x32xf32>
    %57 = arith.addf %54, %56 : vector<8x32xf32>
    %cst_31 = arith.constant 0.000000e+00 : f32
    %58 = vector.broadcast %cst_31 : f32 to vector<8x32xf32>
    %59 = arith.maximumf %57, %58 : vector<8x32xf32>
    %60 = vector.extract_strided_slice %6 {offsets = [32, 0], sizes = [8, 32], strides = [1, 1]} : vector<64x32xf32> to vector<8x32xf32>
    %61 = arith.truncf %50 : vector<8x32xf32> to vector<8x32xbf16>
    %cst_32 = arith.constant dense<0.000000e+00> : vector<8x32xf32>
    %62 = tpu.matmul %61, %8, %cst_32 {dimension_numbers = #tpu.dot_dimension_numbers<[1], [0], [0], [1], [0, 0, 1, 1], [], []>} : vector<8x32xbf16>, vector<32x32xbf16>, vector<8x32xf32> -> vector<8x32xf32>
    %63 = arith.addf %60, %62 : vector<8x32xf32>
    %cst_33 = arith.constant 0.000000e+00 : f32
    %64 = vector.broadcast %cst_33 : f32 to vector<8x32xf32>
    %65 = arith.maximumf %63, %64 : vector<8x32xf32>
    %66 = arith.truncf %50 : vector<8x32xf32> to vector<8x32xbf16>
    %cst_34 = arith.constant dense<0.000000e+00> : vector<8x32xf32>
    %67 = tpu.matmul %66, %12, %cst_34 {dimension_numbers = #tpu.dot_dimension_numbers<[1], [0], [0], [1], [0, 0, 1, 1], [], []>} : vector<8x32xbf16>, vector<32x32xbf16>, vector<8x32xf32> -> vector<8x32xf32>
    %68 = vector.broadcast %14 : vector<1x32xf32> to vector<8x32xf32>
    %69 = arith.addf %67, %68 : vector<8x32xf32>
    %70 = arith.truncf %59 : vector<8x32xf32> to vector<8x32xbf16>
    %cst_35 = arith.constant dense<0.000000e+00> : vector<8x32xf32>
    %71 = tpu.matmul %70, %10, %cst_35 {dimension_numbers = #tpu.dot_dimension_numbers<[1], [0], [0], [1], [0, 0, 1, 1], [], []>} : vector<8x32xbf16>, vector<32x32xbf16>, vector<8x32xf32> -> vector<8x32xf32>
    %72 = arith.addf %69, %71 : vector<8x32xf32>
    %cst_36 = arith.constant 0.000000e+00 : f32
    %73 = vector.broadcast %cst_36 : f32 to vector<8x32xf32>
    %74 = arith.maximumf %72, %73 : vector<8x32xf32>
    %75 = vector.extract_strided_slice %6 {offsets = [40, 0], sizes = [8, 32], strides = [1, 1]} : vector<64x32xf32> to vector<8x32xf32>
    %76 = arith.truncf %65 : vector<8x32xf32> to vector<8x32xbf16>
    %cst_37 = arith.constant dense<0.000000e+00> : vector<8x32xf32>
    %77 = tpu.matmul %76, %8, %cst_37 {dimension_numbers = #tpu.dot_dimension_numbers<[1], [0], [0], [1], [0, 0, 1, 1], [], []>} : vector<8x32xbf16>, vector<32x32xbf16>, vector<8x32xf32> -> vector<8x32xf32>
    %78 = arith.addf %75, %77 : vector<8x32xf32>
    %cst_38 = arith.constant 0.000000e+00 : f32
    %79 = vector.broadcast %cst_38 : f32 to vector<8x32xf32>
    %80 = arith.maximumf %78, %79 : vector<8x32xf32>
    %81 = arith.truncf %65 : vector<8x32xf32> to vector<8x32xbf16>
    %cst_39 = arith.constant dense<0.000000e+00> : vector<8x32xf32>
    %82 = tpu.matmul %81, %12, %cst_39 {dimension_numbers = #tpu.dot_dimension_numbers<[1], [0], [0], [1], [0, 0, 1, 1], [], []>} : vector<8x32xbf16>, vector<32x32xbf16>, vector<8x32xf32> -> vector<8x32xf32>
    %83 = vector.broadcast %14 : vector<1x32xf32> to vector<8x32xf32>
    %84 = arith.addf %82, %83 : vector<8x32xf32>
    %85 = arith.truncf %74 : vector<8x32xf32> to vector<8x32xbf16>
    %cst_40 = arith.constant dense<0.000000e+00> : vector<8x32xf32>
    %86 = tpu.matmul %85, %10, %cst_40 {dimension_numbers = #tpu.dot_dimension_numbers<[1], [0], [0], [1], [0, 0, 1, 1], [], []>} : vector<8x32xbf16>, vector<32x32xbf16>, vector<8x32xf32> -> vector<8x32xf32>
    %87 = arith.addf %84, %86 : vector<8x32xf32>
    %cst_41 = arith.constant 0.000000e+00 : f32
    %88 = vector.broadcast %cst_41 : f32 to vector<8x32xf32>
    %89 = arith.maximumf %87, %88 : vector<8x32xf32>
    %90 = vector.extract_strided_slice %6 {offsets = [48, 0], sizes = [8, 32], strides = [1, 1]} : vector<64x32xf32> to vector<8x32xf32>
    %91 = arith.truncf %80 : vector<8x32xf32> to vector<8x32xbf16>
    %cst_42 = arith.constant dense<0.000000e+00> : vector<8x32xf32>
    %92 = tpu.matmul %91, %8, %cst_42 {dimension_numbers = #tpu.dot_dimension_numbers<[1], [0], [0], [1], [0, 0, 1, 1], [], []>} : vector<8x32xbf16>, vector<32x32xbf16>, vector<8x32xf32> -> vector<8x32xf32>
    %93 = arith.addf %90, %92 : vector<8x32xf32>
    %cst_43 = arith.constant 0.000000e+00 : f32
    %94 = vector.broadcast %cst_43 : f32 to vector<8x32xf32>
    %95 = arith.maximumf %93, %94 : vector<8x32xf32>
    %96 = arith.truncf %80 : vector<8x32xf32> to vector<8x32xbf16>
    %cst_44 = arith.constant dense<0.000000e+00> : vector<8x32xf32>
    %97 = tpu.matmul %96, %12, %cst_44 {dimension_numbers = #tpu.dot_dimension_numbers<[1], [0], [0], [1], [0, 0, 1, 1], [], []>} : vector<8x32xbf16>, vector<32x32xbf16>, vector<8x32xf32> -> vector<8x32xf32>
    %98 = vector.broadcast %14 : vector<1x32xf32> to vector<8x32xf32>
    %99 = arith.addf %97, %98 : vector<8x32xf32>
    %100 = arith.truncf %89 : vector<8x32xf32> to vector<8x32xbf16>
    %cst_45 = arith.constant dense<0.000000e+00> : vector<8x32xf32>
    %101 = tpu.matmul %100, %10, %cst_45 {dimension_numbers = #tpu.dot_dimension_numbers<[1], [0], [0], [1], [0, 0, 1, 1], [], []>} : vector<8x32xbf16>, vector<32x32xbf16>, vector<8x32xf32> -> vector<8x32xf32>
    %102 = arith.addf %99, %101 : vector<8x32xf32>
    %cst_46 = arith.constant 0.000000e+00 : f32
    %103 = vector.broadcast %cst_46 : f32 to vector<8x32xf32>
    %104 = arith.maximumf %102, %103 : vector<8x32xf32>
    %105 = vector.extract_strided_slice %6 {offsets = [56, 0], sizes = [8, 32], strides = [1, 1]} : vector<64x32xf32> to vector<8x32xf32>
    %106 = arith.truncf %95 : vector<8x32xf32> to vector<8x32xbf16>
    %cst_47 = arith.constant dense<0.000000e+00> : vector<8x32xf32>
    %107 = tpu.matmul %106, %8, %cst_47 {dimension_numbers = #tpu.dot_dimension_numbers<[1], [0], [0], [1], [0, 0, 1, 1], [], []>} : vector<8x32xbf16>, vector<32x32xbf16>, vector<8x32xf32> -> vector<8x32xf32>
    %108 = arith.addf %105, %107 : vector<8x32xf32>
    %cst_48 = arith.constant 0.000000e+00 : f32
    %109 = vector.broadcast %cst_48 : f32 to vector<8x32xf32>
    %110 = arith.maximumf %108, %109 : vector<8x32xf32>
    %111 = arith.truncf %95 : vector<8x32xf32> to vector<8x32xbf16>
    %cst_49 = arith.constant dense<0.000000e+00> : vector<8x32xf32>
    %112 = tpu.matmul %111, %12, %cst_49 {dimension_numbers = #tpu.dot_dimension_numbers<[1], [0], [0], [1], [0, 0, 1, 1], [], []>} : vector<8x32xbf16>, vector<32x32xbf16>, vector<8x32xf32> -> vector<8x32xf32>
    %113 = vector.broadcast %14 : vector<1x32xf32> to vector<8x32xf32>
    %114 = arith.addf %112, %113 : vector<8x32xf32>
    %115 = arith.truncf %104 : vector<8x32xf32> to vector<8x32xbf16>
    %cst_50 = arith.constant dense<0.000000e+00> : vector<8x32xf32>
    %116 = tpu.matmul %115, %10, %cst_50 {dimension_numbers = #tpu.dot_dimension_numbers<[1], [0], [0], [1], [0, 0, 1, 1], [], []>} : vector<8x32xbf16>, vector<32x32xbf16>, vector<8x32xf32> -> vector<8x32xf32>
    %117 = arith.addf %114, %116 : vector<8x32xf32>
    %cst_51 = arith.constant 0.000000e+00 : f32
    %118 = vector.broadcast %cst_51 : f32 to vector<8x32xf32>
    %119 = arith.maximumf %117, %118 : vector<8x32xf32>
    %120 = arith.truncf %110 : vector<8x32xf32> to vector<8x32xbf16>
    %cst_52 = arith.constant dense<0.000000e+00> : vector<8x32xf32>
    %121 = tpu.matmul %120, %12, %cst_52 {dimension_numbers = #tpu.dot_dimension_numbers<[1], [0], [0], [1], [0, 0, 1, 1], [], []>} : vector<8x32xbf16>, vector<32x32xbf16>, vector<8x32xf32> -> vector<8x32xf32>
    %122 = vector.broadcast %14 : vector<1x32xf32> to vector<8x32xf32>
    %123 = arith.addf %121, %122 : vector<8x32xf32>
    %124 = arith.truncf %119 : vector<8x32xf32> to vector<8x32xbf16>
    %cst_53 = arith.constant dense<0.000000e+00> : vector<8x32xf32>
    %125 = tpu.matmul %124, %10, %cst_53 {dimension_numbers = #tpu.dot_dimension_numbers<[1], [0], [0], [1], [0, 0, 1, 1], [], []>} : vector<8x32xbf16>, vector<32x32xbf16>, vector<8x32xf32> -> vector<8x32xf32>
    %126 = arith.addf %123, %125 : vector<8x32xf32>
    %cst_54 = arith.constant 0.000000e+00 : f32
    %127 = vector.broadcast %cst_54 : f32 to vector<8x32xf32>
    %128 = arith.maximumf %126, %127 : vector<8x32xf32>
    %129 = arith.truncf %128 : vector<8x32xf32> to vector<8x32xbf16>
    %c0_55 = arith.constant 0 : index
    %c0_56 = arith.constant 0 : index
    %130 = vector.load %arg6[%c0_55, %c0_56] : memref<32x1xbf16, #tpu.memory_space<vmem>>, vector<32x1xbf16>
    %cst_57 = arith.constant dense<0.000000e+00> : vector<8x1xf32>
    %131 = tpu.matmul %129, %130, %cst_57 {dimension_numbers = #tpu.dot_dimension_numbers<[1], [0], [0], [1], [0, 0, 1, 1], [], []>} : vector<8x32xbf16>, vector<32x1xbf16>, vector<8x1xf32> -> vector<8x1xf32>
    %c0_58 = arith.constant 0 : index
    %c0_59 = arith.constant 0 : index
    %132 = vector.load %arg1[%c0_58, %c0_59] : memref<8x4xbf16, #tpu.memory_space<vmem>>, vector<8x4xbf16>
    %c0_60 = arith.constant 0 : index
    %c0_61 = arith.constant 0 : index
    %133 = vector.load %arg7[%c0_60, %c0_61] : memref<4x1xbf16, #tpu.memory_space<vmem>>, vector<4x1xbf16>
    %cst_62 = arith.constant dense<0.000000e+00> : vector<8x1xf32>
    %134 = tpu.matmul %132, %133, %cst_62 {dimension_numbers = #tpu.dot_dimension_numbers<[1], [0], [0], [1], [0, 0, 1, 1], [], []>} : vector<8x4xbf16>, vector<4x1xbf16>, vector<8x1xf32> -> vector<8x1xf32>
    %135 = arith.addf %131, %134 : vector<8x1xf32>
    %c0_63 = arith.constant 0 : index
    %c0_64 = arith.constant 0 : index
    %136 = vector.load %arg8[%c0_63, %c0_64] : memref<1x1xf32, #tpu.memory_space<vmem>>, vector<1x1xf32>
    %137 = vector.broadcast %136 : vector<1x1xf32> to vector<8x1xf32>
    %138 = arith.addf %135, %137 : vector<8x1xf32>
    %c0_65 = arith.constant 0 : index
    %c0_66 = arith.constant 0 : index
    %139 = vector.load %arg9[%c0_65, %c0_66] : memref<8x1xf32, #tpu.memory_space<vmem>>, vector<8x1xf32>
    tpu.vector_store %arg9[%c0_65, %c0_66], %138 {strides = array<i32>} : memref<8x1xf32, #tpu.memory_space<vmem>>, vector<8x1xf32>,
    return
  }
}

</mosaic_0001>

<bundles_post_ra>
// kernel: rnn_forward.1
= control target key start
LH: loop header
LB: loop body
LE: loop exit
PB: predicated region body
PF: predicated region fallthrough
CT: control target
= control target key end

     0   :  { %vm81_vm0 = vcmask 1043456   ;;  %vm68_vm1 = vcmask 64512   ;;  %vm143_vm2 = vcmask 261120   ;;  %vm556_vm3 = vcmask 1041408   ;;  %s918_s2 = inlined_call_operand.vmem [shape: bf16[8,32], index: 2, kind: input, shape index: {}]   ;;  %s919_s0 = inlined_call_operand.vmem [shape: bf16[64,8], index: 0, kind: input, shape index: {}]   ;;  %s920_s5 = inlined_call_operand.vmem [shape: f32[2,1,32], index: 5, kind: input, shape index: {}]   ;;  %s921_s4 = inlined_call_operand.vmem [shape: bf16[2,32,32], index: 4, kind: input, shape index: {}]   ;;  %s922_s3 = inlined_call_operand.vmem [shape: bf16[1,32,32], index: 3, kind: input, shape index: {}]   ;;  %s923_s7 = inlined_call_operand.vmem [shape: bf16[4,1], index: 7, kind: input, shape index: {}]   ;;  %s924_s6 = inlined_call_operand.vmem [shape: bf16[32,1], index: 6, kind: input, shape index: {}]   ;;  %s925_s1 = inlined_call_operand.vmem [shape: bf16[8,4], index: 1, kind: input, shape index: {}]   ;;  %s926_s8 = inlined_call_operand.<no memory space> [shape: f32[1,1], index: 8, kind: input, shape index: {}]   ;;  %s927_s9 = inlined_call_operand.vmem [shape: f32[8,1], index: 9, kind: output, shape index: {}]  }
   0x1   :  { %v43_v0 = vld [vmem:[%s918_s2] sm:$0xf]  ;;  %v768_v3 = vld [vmem:[%s921_s4 + $0x8] sm:$0xff]  ;;  %v814_v13 = vld [vmem:[%s921_s4 + $0x18] sm:$0xff]  ;;  %vm552_vm4 = vcmask 31744   ;;  %vm606_vm5 = vcmask 7168  }
   0x2   :  { %v83_v1 = vsel %vm81_vm0, %v43_v0, 0  ;;  %v693_v2 = vld [vmem:[%s919_s0] sm:$0xff]  ;;  %v773_v4 = vld [vmem:[%s922_s3 + $0x8] sm:$0xff]  ;;  %153 = vmatpush.bf16.msra.mxu1 %v768_v3  ;;  %201 = vmatpush.bf16.msra.mxu3 %v768_v3  ;;  %v821_v14 = vld [vmem:[%s921_s4 + $0x10] sm:$0xff] }
   0x3   :  { %92 = vmatpush.bf16.msra.mxu0 %v83_v1  ;;  %183 = vmatpush.bf16.msra.mxu2 %v773_v4  ;;  %v782_v5 = vld [vmem:[%s921_s4] sm:$0xff]  ;;  %v694_v12 = vld [vmem:[%s919_s0 + $0x8] sm:$0xff]  ;;  %v695_v43 = vld [vmem:[%s919_s0 + $0x10] sm:$0xff] }
   0x4   :  { %v787_v6 = vld [vmem:[%s922_s3] sm:$0xff]  ;;  %v696_v59 = vld [vmem:[%s919_s0 + $0x18] sm:$0xff] }
   0x5   :  { %v800_v7 = vld [vmem:[%s920_s5] ss:$0 sm:$0xff]  ;;  %v831_v20 = vld [vmem:[%s920_s5 + $0x1] ss:$0 sm:$0xff] }
   0x6   :  { %628 = vmatmul.msk.bf16.vlgmr.msra.gmra.mxu0 %vm68_vm1, %v693_v2  ;;  %154 = vmatpush.bf16.msra.mxu1 %v782_v5 }
   0x7   :  { %381 = vmatpush.bf16.msrb.mxu0 %v773_v4  ;;  %184 = vmatpush.bf16.msra.mxu2 %v787_v6 }
   0x8   :  { %202 = vmatpush.bf16.msra.mxu3 %v782_v5 }
   0xa   :  { %216 = vmatpush.bf16.msrb.mxu1 %v773_v4 }
   0xb   :  { %382 = vmatpush.bf16.msrb.mxu0 %v787_v6  ;;  %245 = vmatpush.bf16.msrb.mxu2 %v814_v13 }
   0xc   :  { %264 = vmatpush.bf16.msrb.mxu3 %v768_v3 }
   0xe   :  { %217 = vmatpush.bf16.msrb.mxu1 %v787_v6 }
   0xf   :  { %449 = vmatpush.bf16.msra.mxu0 %v814_v13  ;;  %246 = vmatpush.bf16.msrb.mxu2 %v821_v14 }
  0x10   :  { %265 = vmatpush.bf16.msrb.mxu3 %v782_v5 }
  0x13   :  { %450 = vmatpush.bf16.msra.mxu0 %v821_v14 }
  0x16   :  { %629 = vmatmul.msk.bf16.gmra.mxu0 %vm68_vm1, %v694_v12 }
  0x26   :  { %630 = vmatmul.msk.bf16.gmra.mxu0 %vm68_vm1, %v695_v43 }
  0x36   :  { %631 = vmatmul.msk.bf16.gmra.mxu0 %vm68_vm1, %v696_v59 }
  0x83   :  { %v94_v8 = vpop.f32.mrf.mxu0 }
  0x84   :  { %v95_v9 = vadd.f32 %v800_v7, %v94_v8 }
  0x86   :  { %v129_v10 = vmax.f32 %v95_v9, 0.0 }
  0x88   :  { %v130_v11 = vpack.c.bf16 %v129_v10, %v129_v10 }
  0x8a   :  { %645 = vmatmul.msk.bf16.vlgmr.msra.gmra.mxu1 %vm143_vm2, %v130_v11  ;;  %654 = vmatmul.msk.bf16.vlgmr.msra.gmra.mxu2 %vm143_vm2, %v130_v11 }
  0x8b   :  { %279 = vmatpush.bf16.msra.mxu1 %v773_v4  ;;  %296 = vmatpush.bf16.msra.mxu2 %v814_v13  ;;  %v96_v15 = vpop.f32.mrf.mxu0 }
  0x8c   :  { %v97_v16 = vadd.f32 %v800_v7, %v96_v15 }
  0x8f   :  { %280 = vmatpush.bf16.msra.mxu1 %v787_v6  ;;  %297 = vmatpush.bf16.msra.mxu2 %v821_v14 }
  0x93   :  { %v99_v29 = vpop.f32.mrf.mxu0 }
  0x94   :  { %v100_v30 = vadd.f32 %v800_v7, %v99_v29 }
  0x9b   :  { %v101_v45 = vpop.f32.mrf.mxu0 }
  0x9c   :  { %v102_v46 = vadd.f32 %v800_v7, %v101_v45  ;;  %v704_v45 = vld [vmem:[%s924_s6 + $0x8] sm:$0xff] }
  0xa3   :  { %v104_v61 = vpop.f32.mrf.mxu0 }
  0xa4   :  { %v105_v62 = vadd.f32 %v800_v7, %v104_v61  ;;  %v703_v61 = vld [vmem:[%s924_s6] sm:$0xff] }
 0x107   :  { %v156_v17 = vpop.f32.mrf.mxu1 }
 0x108   :  { %v160_v18 = vadd.f32 %v156_v17, %v97_v16  ;;  %v106_v16 = vpop.f32.mrf.mxu0 }
 0x10a   :  { %v161_v19 = vmax.f32 %v160_v18, 0.0 }
 0x10c   :  { %v191_v21 = vpack.c.bf16 %v161_v19, %v161_v19 }
 0x10d   :  { %v186_v22 = vpop.f32.mrf.mxu2 }
 0x10e   :  { %v187_v23 = vadd.f32 %v831_v20, %v186_v22  ;;  %655 = vmatmul.msk.bf16.vlgmr.msra.gmra.mxu3 %vm143_vm2, %v191_v21  ;;  %656 = vmatmul.msk.bf16.vlgmr.msrb.gmra.mxu1 %vm143_vm2, %v191_v21  ;;  %v107_v21 = vadd.f32 %v800_v7, %v106_v16 }
 0x10f   :  { %v158_v24 = vpop.f32.mrf.mxu1  ;;  %315 = vmatpush.bf16.msra.mxu3 %v768_v3  ;;  %330 = vmatpush.bf16.msrb.mxu1 %v773_v4 }
 0x110   :  { %v190_v25 = vmax.f32 %v187_v23, 0.0  ;;  %v109_v17 = vpop.f32.mrf.mxu0 }
 0x112   :  { %v223_v26 = vpack.c.bf16 %v190_v25, %v190_v25 }
 0x113   :  { %316 = vmatpush.bf16.msra.mxu3 %v782_v5  ;;  %331 = vmatpush.bf16.msrb.mxu1 %v787_v6 }
 0x114   :  { %665 = vmatmul.msk.bf16.vlgmr.msrb.gmra.mxu2 %vm143_vm2, %v223_v26 }
 0x115   :  { %v188_v27 = vpop.f32.mrf.mxu2  ;;  %347 = vmatpush.bf16.msrb.mxu2 %v814_v13 }
 0x118   :  { %v111_v18 = vpop.f32.mrf.mxu0 }
 0x119   :  { %348 = vmatpush.bf16.msrb.mxu2 %v821_v14 }
 0x18b   :  { %v219_v28 = vpop.f32.mrf.mxu1 }
 0x18c   :  { %v220_v35 = vadd.f32 %v831_v20, %v219_v28 }
 0x191   :  { %v204_v31 = vpop.f32.mrf.mxu3 }
 0x192   :  { %v208_v32 = vadd.f32 %v204_v31, %v100_v30  ;;  %v110_v31 = vadd.f32 %v800_v7, %v109_v17 }
 0x193   :  { %v221_v33 = vpop.f32.mrf.mxu1 }
 0x194   :  { %v209_v34 = vmax.f32 %v208_v32, 0.0 }
 0x196   :  { %v254_v36 = vpack.c.bf16 %v209_v34, %v209_v34 }
 0x197   :  { %v248_v37 = vpop.f32.mrf.mxu2 }
 0x198   :  { %v252_v38 = vadd.f32 %v248_v37, %v220_v35  ;;  %666 = vmatmul.msk.bf16.vlgmr.msrb.gmra.mxu3 %vm143_vm2, %v254_v36  ;;  %667 = vmatmul.msk.bf16.vlgmr.msra.gmra.mxu1 %vm143_vm2, %v254_v36 }
 0x199   :  { %v206_v39 = vpop.f32.mrf.mxu3  ;;  %366 = vmatpush.bf16.msrb.mxu3 %v768_v3  ;;  %398 = vmatpush.bf16.msra.mxu1 %v814_v13 }
 0x19a   :  { %v253_v40 = vmax.f32 %v252_v38, 0.0 }
 0x19c   :  { %v286_v41 = vpack.c.bf16 %v253_v40, %v253_v40 }
 0x19d   :  { %367 = vmatpush.bf16.msrb.mxu3 %v782_v5  ;;  %399 = vmatpush.bf16.msra.mxu1 %v821_v14 }
 0x19e   :  { %668 = vmatmul.msk.bf16.vlgmr.msra.gmra.mxu2 %vm143_vm2, %v286_v41 }
 0x19f   :  { %v250_v42 = vpop.f32.mrf.mxu2  ;;  %417 = vmatpush.bf16.msra.mxu2 %v768_v3 }
 0x1a3   :  { %418 = vmatpush.bf16.msra.mxu2 %v782_v5 }
 0x215   :  { %v282_v44 = vpop.f32.mrf.mxu1 }
 0x216   :  { %v283_v51 = vadd.f32 %v831_v20, %v282_v44  ;;  %v551_v44 = vld [vmem:[%s923_s7] sm:$0x3] }
 0x21b   :  { %v267_v47 = vpop.f32.mrf.mxu3 }
 0x21c   :  { %v271_v48 = vadd.f32 %v267_v47, %v102_v46  ;;  %v558_v46 = vsel %vm556_vm3, %v551_v44, 0  ;;  %v112_v47 = vadd.f32 %v800_v7, %v111_v18  ;;  %v550_v7 = vld [vmem:[%s925_s1] sm:$0xf] }
 0x21d   :  { %v284_v49 = vpop.f32.mrf.mxu1 }
 0x21e   :  { %v272_v50 = vmax.f32 %v271_v48, 0.0 }
 0x220   :  { %v305_v52 = vpack.c.bf16 %v272_v50, %v272_v50 }
 0x221   :  { %v299_v53 = vpop.f32.mrf.mxu2 }
 0x222   :  { %v303_v54 = vadd.f32 %v299_v53, %v283_v51  ;;  %669 = vmatmul.msk.bf16.vlgmr.msra.gmra.mxu3 %vm143_vm2, %v305_v52  ;;  %670 = vmatmul.msk.bf16.vlgmr.msrb.gmra.mxu1 %vm143_vm2, %v305_v52 }
 0x223   :  { %v269_v55 = vpop.f32.mrf.mxu3  ;;  %432 = vmatpush.bf16.msra.mxu3 %v773_v4  ;;  %468 = vmatpush.bf16.msrb.mxu1 %v768_v3 }
 0x224   :  { %v304_v56 = vmax.f32 %v303_v54, 0.0 }
 0x226   :  { %v337_v57 = vpack.c.bf16 %v304_v56, %v304_v56 }
 0x227   :  { %433 = vmatpush.bf16.msra.mxu3 %v787_v6  ;;  %469 = vmatpush.bf16.msrb.mxu1 %v782_v5 }
 0x228   :  { %671 = vmatmul.msk.bf16.vlgmr.msrb.gmra.mxu2 %vm143_vm2, %v337_v57 }
 0x229   :  { %v301_v58 = vpop.f32.mrf.mxu2  ;;  %483 = vmatpush.bf16.msrb.mxu2 %v773_v4 }
 0x22d   :  { %484 = vmatpush.bf16.msrb.mxu2 %v787_v6 }
 0x29f   :  { %v333_v60 = vpop.f32.mrf.mxu1 }
 0x2a0   :  { %v334_v3 = vadd.f32 %v831_v20, %v333_v60 }
 0x2a5   :  { %v318_v63 = vpop.f32.mrf.mxu3 }
 0x2a6   :  { %v322_v0 = vadd.f32 %v318_v63, %v105_v62 }
 0x2a7   :  { %v335_v1 = vpop.f32.mrf.mxu1 }
 0x2a8   :  { %v323_v2 = vmax.f32 %v322_v0, 0.0 }
 0x2aa   :  { %v356_v5 = vpack.c.bf16 %v323_v2, %v323_v2 }
 0x2ab   :  { %v350_v8 = vpop.f32.mrf.mxu2 }
 0x2ac   :  { %v354_v9 = vadd.f32 %v350_v8, %v334_v3  ;;  %672 = vmatmul.msk.bf16.vlgmr.msrb.gmra.mxu3 %vm143_vm2, %v356_v5  ;;  %673 = vmatmul.msk.bf16.vlgmr.msrb.gmra.mxu0 %vm143_vm2, %v356_v5 }
 0x2ad   :  { %v320_v10 = vpop.f32.mrf.mxu3  ;;  %500 = vmatpush.bf16.msrb.mxu3 %v814_v13  ;;  %519 = vmatpush.bf16.msrb.mxu0 %v773_v4 }
 0x2ae   :  { %v355_v11 = vmax.f32 %v354_v9, 0.0  ;;  %v14_v9 = vstv %s926_s8 }
 0x2af   :  { %15 = vst [vmem:[#allocation2] sm:$0x1] %v14_v9 }
 0x2b0   :  { %v388_v12 = vpack.c.bf16 %v355_v11, %v355_v11 }
 0x2b1   :  { %501 = vmatpush.bf16.msrb.mxu3 %v821_v14  ;;  %520 = vmatpush.bf16.msrb.mxu0 %v787_v6 }
 0x2b2   :  { %674 = vmatmul.msk.bf16.vlgmr.msra.gmra.mxu1 %vm143_vm2, %v388_v12 }
 0x2b3   :  { %v352_v15 = vpop.f32.mrf.mxu2  ;;  %536 = vmatpush.bf16.msra.mxu1 %v814_v13 }
 0x2b6   :  { %v707_v12 = vld [vmem:[#allocation2] ss:$0 sm:$0xff] }
 0x2b7   :  { %537 = vmatpush.bf16.msra.mxu1 %v821_v14 }
 0x329   :  { %v384_v19 = vpop.f32.mrf.mxu0 }
 0x32a   :  { %v385_v4 = vadd.f32 %v831_v20, %v384_v19 }
 0x32f   :  { %v369_v22 = vpop.f32.mrf.mxu3  ;;  %v401_v23 = vpop.f32.mrf.mxu1 }
 0x330   :  { %v373_v24 = vadd.f32 %v369_v22, %v107_v21  ;;  %v405_v25 = vadd.f32 %v401_v23, %v385_v4 }
 0x331   :  { %v386_v6 = vpop.f32.mrf.mxu0 }
 0x332   :  { %v374_v26 = vmax.f32 %v373_v24, 0.0  ;;  %v406_v27 = vmax.f32 %v405_v25, 0.0 }
 0x334   :  { %v407_v28 = vpack.c.bf16 %v374_v26, %v374_v26  ;;  %v439_v29 = vpack.c.bf16 %v406_v27, %v406_v27 }
 0x336   :  { %675 = vmatmul.msk.bf16.vlgmr.msra.gmra.mxu2 %vm143_vm2, %v407_v28  ;;  %676 = vmatmul.msk.bf16.vlgmr.msra.gmra.mxu3 %vm143_vm2, %v407_v28 }
 0x337   :  { %677 = vmatmul.msk.bf16.vlgmr.msra.gmra.mxu0 %vm143_vm2, %v439_v29  ;;  %v371_v13 = vpop.f32.mrf.mxu3  ;;  %v403_v14 = vpop.f32.mrf.mxu1  ;;  %567 = vmatpush.bf16.msra.mxu2 %v558_v46 }
 0x338   :  { %594 = vmatpush.bf16.msra.mxu3 %v704_v45 }
 0x33c   :  { %595 = vmatpush.bf16.msra.mxu3 %v703_v61 }
 0x3b4   :  { %v452_v30 = vpop.f32.mrf.mxu0 }
 0x3b9   :  { %v420_v32 = vpop.f32.mrf.mxu2  ;;  %v435_v33 = vpop.f32.mrf.mxu3 }
 0x3ba   :  { %v424_v34 = vadd.f32 %v420_v32, %v110_v31  ;;  %v436_v35 = vadd.f32 %v831_v20, %v435_v33 }
 0x3bc   :  { %v425_v36 = vmax.f32 %v424_v34, 0.0  ;;  %v456_v37 = vadd.f32 %v452_v30, %v436_v35  ;;  %v454_v38 = vpop.f32.mrf.mxu0 }
 0x3be   :  { %v458_v39 = vpack.c.bf16 %v425_v36, %v425_v36  ;;  %v457_v40 = vmax.f32 %v456_v37, 0.0 }
 0x3c0   :  { %v490_v41 = vpack.c.bf16 %v457_v40, %v457_v40  ;;  %678 = vmatmul.msk.bf16.vlgmr.msrb.gmra.mxu1 %vm143_vm2, %v458_v39  ;;  %679 = vmatmul.msk.bf16.vlgmr.msrb.gmra.mxu2 %vm143_vm2, %v458_v39 }
 0x3c1   :  { %v422_v42 = vpop.f32.mrf.mxu2  ;;  %v437_v43 = vpop.f32.mrf.mxu3 }
 0x3c2   :  { %680 = vmatmul.msk.bf16.vlgmr.msrb.gmra.mxu3 %vm143_vm2, %v490_v41 }
 0x3d0   :  { %683 = vmatmul.msk.bf16.vlgmr.msra.gmra.mxu2 %vm552_vm4, %v550_v7 }
 0x43d   :  { %v471_v48 = vpop.f32.mrf.mxu1 }
 0x43e   :  { %v475_v49 = vadd.f32 %v471_v48, %v112_v47 }
 0x440   :  { %v476_v50 = vmax.f32 %v475_v49, 0.0 }
 0x442   :  { %v509_v51 = vpack.c.bf16 %v476_v50, %v476_v50 }
 0x443   :  { %v486_v52 = vpop.f32.mrf.mxu2 }
 0x444   :  { %v487_v53 = vadd.f32 %v831_v20, %v486_v52  ;;  %681 = vmatmul.msk.bf16.vlgmr.msrb.gmra.mxu0 %vm143_vm2, %v509_v51 }
 0x445   :  { %v473_v54 = vpop.f32.mrf.mxu1  ;;  %v503_v55 = vpop.f32.mrf.mxu3 }
 0x446   :  { %v507_v56 = vadd.f32 %v503_v55, %v487_v53 }
 0x448   :  { %v508_v57 = vmax.f32 %v507_v56, 0.0 }
 0x44a   :  { %v526_v58 = vpack.c.bf16 %v508_v57, %v508_v57 }
 0x44b   :  { %v488_v59 = vpop.f32.mrf.mxu2 }
 0x44c   :  { %682 = vmatmul.msk.bf16.vlgmr.msra.gmra.mxu1 %vm143_vm2, %v526_v58 }
 0x44d   :  { %v505_v60 = vpop.f32.mrf.mxu3 }
 0x453   :  { %v569_v10 = vpop.f32.mrf.mxu2 }
 0x45b   :  { %v571_v11 = vpop.f32.mrf.mxu2 }
 0x4c1   :  { %v522_v62 = vpop.f32.mrf.mxu0 }
 0x4c2   :  { %v523_v63 = vadd.f32 %v831_v20, %v522_v62 }
 0x4c9   :  { %v524_v0 = vpop.f32.mrf.mxu0  ;;  %v539_v1 = vpop.f32.mrf.mxu1 }
 0x4ca   :  { %v543_v2 = vadd.f32 %v539_v1, %v523_v63 }
 0x4cc   :  { %v544_v3 = vmax.f32 %v543_v2, 0.0 }
 0x4ce   :  { %v545_v5 = vpack.c.bf16 %v544_v3, %v544_v3 }
 0x4d0   :  { %692 = vmatmul.msk.bf16.vlgmr.msra.gmra.mxu3 %vm143_vm2, %v545_v5 }
 0x4d1   :  { %v541_v8 = vpop.f32.mrf.mxu1 }
 0x553   :  { %v597_v15 = vpop.f32.mrf.mxu3 }
 0x554   :  { %v598_v16 = vadd.f32 %v597_v15, %v569_v10 }
 0x556   :  { %v605_v20 = vadd.f32 %v707_v12, %v598_v16 }
 0x558   :  { %607 = vst.msk [vmem:[%s927_s9] sm:$0xff] %vm606_vm5, %v605_v20 }
 0x55b   :  { %v599_v17 = vpop.f32.mrf.mxu3 }

</bundles_post_ra>
